<compile_context>
chip_gen: v6e
topology: v6e:2x2x1
jax: 0.10.0
libtpu: 0.0.40
codegen_flags: <defaults>
</compile_context>

<pallas_src>
import jax
import jax.numpy as jnp
from jax import lax
from jax.experimental import pallas as pl
from jax.experimental.pallas import tpu as pltpu


def _adaptive_conv_kernel(xoff_ref, w2_ref, u_ref, o_ref):
    # xoff_ref : (K=C*N, T) f32  bilinearly sampled patches, lane-dense over HW
    # w2_ref   : (O, K)     f32  flattened conv weight (grid-invariant block)
    # u_ref    : (O, 1)     f32  SE gate for this batch element
    # o_ref    : (O, T)     f32  output tile (lane-dense)
    acc = jnp.dot(w2_ref[...], xoff_ref[...],
                  preferred_element_type=jnp.float32)          # (O, T), MXU
    o_ref[...] = (acc * u_ref[...]).astype(o_ref.dtype)        # SE gate


def _pick_tile(hw_pad, batch):
    """Largest lane tile that divides hw_pad, keeping >=2 grid programs."""
    cands = [1024, 512, 256, 128]
    try:  # generation-aware cap: small-VMEM parts (v7x: 64 MiB) prefer <=512
        info = pltpu.get_tpu_info()
        if getattr(info, "vmem_capacity_bytes", 128 << 20) <= (64 << 20):
            cands = [512, 256, 128]
    except Exception:
        pass
    for cand in cands:
        if hw_pad % cand == 0 and (batch * (hw_pad // cand) >= 2 or hw_pad == cand == 128):
            # when batch==1, require >=2 tiles so both v7x TCs are fed
            if batch >= 2 or (hw_pad // cand) >= 2 or hw_pad == 128:
                return cand
    return 128


def adaptive_conv2d(x, params, ks=3, padding=1, stride=1, tile_hw=None):
    """Forward pass of AdaptiveConv2d (modulation=False)."""
    p_w, p_b, conv_w, g1_w, g1_b, g2_w, g2_b = params
    b, c, h, w = x.shape
    outc = conv_w.shape[0]
    N = ks * ks

    # ---- offset branch: p_conv (3x3, pad 1, stride `stride`) -- XLA glue ----
    offset = lax.conv_general_dilated(
        x, p_w, (stride, stride), [(1, 1), (1, 1)],
        dimension_numbers=('NCHW', 'OIHW', 'NCHW')) + p_b[None, :, None, None]
    h_o, w_o = offset.shape[2], offset.shape[3]
    HW = h_o * w_o

    # ---- gate branch: avgpool -> 1x1 conv -> GELU -> 1x1 conv -> sigmoid ----
    gp = jnp.mean(x, axis=(2, 3))                                    # (b, c)
    h1 = jax.nn.gelu(gp @ g1_w.reshape(-1, c).T + g1_b, approximate=False)
    u = jax.nn.sigmoid(h1 @ g2_w.reshape(outc, -1).T + g2_b)         # (b, outc)

    Hp, Wp = h + 2 * padding, w + 2 * padding

    # ---- sampling coordinates p = p_0 + p_n + offset, kept as (b, N, HW) ----
    half = (ks - 1) // 2
    rng = jnp.arange(-half, half + 1)
    pnx, pny = jnp.meshgrid(rng, rng, indexing='ij')
    p_n_x = pnx.reshape(N, 1).astype(jnp.float32)
    p_n_y = pny.reshape(N, 1).astype(jnp.float32)
    p0x, p0y = jnp.meshgrid(jnp.arange(1, h_o * stride + 1, stride),
                            jnp.arange(1, w_o * stride + 1, stride), indexing='ij')
    p0x = p0x.reshape(1, HW).astype(jnp.float32)
    p0y = p0y.reshape(1, HW).astype(jnp.float32)
    off = offset.reshape(b, 2 * N, HW)
    px = off[:, :N] + p0x[None] + p_n_x[None]                        # (b, N, HW)
    py = off[:, N:] + p0y[None] + p_n_y[None]                        # (b, N, HW)

    # ---- corner indices + bilinear weights (all hoisted to the wrapper) ----
    x0 = jnp.floor(px)
    y0 = jnp.floor(py)
    qx_lt = jnp.clip(x0, 0.0, Hp - 1.0)
    qy_lt = jnp.clip(y0, 0.0, Wp - 1.0)
    qx_rb = jnp.clip(x0 + 1.0, 0.0, Hp - 1.0)
    qy_rb = jnp.clip(y0 + 1.0, 0.0, Wp - 1.0)
    pcx = jnp.clip(px, 0.0, Hp - 1.0)
    pcy = jnp.clip(py, 0.0, Wp - 1.0)

    g_lt = (1.0 + (qx_lt - pcx)) * (1.0 + (qy_lt - pcy))
    g_rb = (1.0 - (qx_rb - pcx)) * (1.0 - (qy_rb - pcy))
    g_lb = (1.0 + (qx_lt - pcx)) * (1.0 - (qy_rb - pcy))
    g_rt = (1.0 - (qx_rb - pcx)) * (1.0 + (qy_lt - pcy))

    # ---- 4-corner gather via XLA's native TPU gather + bilinear blend ----
    x_pad = jnp.pad(x, ((0, 0), (0, 0), (padding, padding), (padding, padding)))
    x_flat = x_pad.reshape(b, c, Hp * Wp)

    def gather(qx, qy):
        idx = qx.astype(jnp.int32) * Wp + qy.astype(jnp.int32)       # (b, N, HW)
        idx = jnp.broadcast_to(idx[:, None], (b, c, N, HW)).reshape(b, c, N * HW)
        return jnp.take_along_axis(x_flat, idx, axis=-1).reshape(b, c, N, HW)

    x_lt = gather(qx_lt, qy_lt)
    x_rb = gather(qx_rb, qy_rb)
    x_lb = gather(qx_lt, qy_rb)
    x_rt = gather(qx_rb, qy_lt)

    x_off = (g_lt[:, None] * x_lt + g_rb[:, None] * x_rb +
             g_lb[:, None] * x_lb + g_rt[:, None] * x_rt)            # (b,c,N,HW)
    K = c * N
    x_off = x_off.reshape(b, K, HW).astype(jnp.float32)

    # ---- lane padding: keep output stores full-width (no masked stores) ----
    HW_pad = ((HW + 127) // 128) * 128
    if HW_pad != HW:
        x_off = jnp.pad(x_off, ((0, 0), (0, 0), (0, HW_pad - HW)))

    if tile_hw is None:
        tile_hw = _pick_tile(HW_pad, b)
    n_tiles = HW_pad // tile_hw

    # ---- flattened conv weight (O, C*N) matches the (c, n) ordering above ----
    w2 = conv_w.reshape(outc, K).astype(jnp.float32)
    u3 = u.reshape(b, outc, 1).astype(jnp.float32)

    # ---- generation-safe VMEM budget (blocks are tiny now) ----
    bytes_blocks = 4 * (2 * K * tile_hw        # x_off (double-buffered)
                        + 2 * outc * tile_hw   # out   (double-buffered)
                        + outc * K + outc)     # w2 + gate
    vmem_limit = int(min(28 * 2**20, max(4 * 2**20, 4 * bytes_blocks)))

    out_pad = pl.pallas_call(
        _adaptive_conv_kernel,
        out_shape=jax.ShapeDtypeStruct((b, outc, HW_pad), jnp.float32),
        grid_spec=pltpu.PrefetchScalarGridSpec(
            num_scalar_prefetch=0,
            grid=(b, n_tiles),
            in_specs=[
                pl.BlockSpec((None, K, tile_hw), lambda bi, ti: (bi, 0, ti)),
                pl.BlockSpec((outc, K), lambda bi, ti: (0, 0)),
                pl.BlockSpec((None, outc, 1), lambda bi, ti: (bi, 0, 0)),
            ],
            out_specs=pl.BlockSpec((None, outc, tile_hw),
                                   lambda bi, ti: (bi, 0, ti)),
        ),
        compiler_params=pltpu.CompilerParams(
            dimension_semantics=("parallel", "parallel"),
            vmem_limit_bytes=vmem_limit),
    )(x_off, w2, u3)

    return out_pad[:, :, :HW].reshape(b, outc, h_o, w_o)             # NCHW


def reference_forward(x, params, ks=3, padding=1, stride=1):
    """Pure-JAX transcription of the PyTorch forward (for verification)."""
    p_w, p_b, conv_w, g1_w, g1_b, g2_w, g2_b = params
    b, c, h, w = x.shape
    outc = conv_w.shape[0]
    N = ks * ks

    offset = lax.conv_general_dilated(
        x, p_w, (stride, stride), [(1, 1), (1, 1)],
        dimension_numbers=('NCHW', 'OIHW', 'NCHW')) + p_b[None, :, None, None]
    gp = jnp.mean(x, axis=(2, 3))
    h1 = jax.nn.gelu(gp @ g1_w.reshape(-1, c).T + g1_b, approximate=False)
    u = jax.nn.sigmoid(h1 @ g2_w.reshape(outc, -1).T + g2_b)

    x_pad = jnp.pad(x, ((0, 0), (0, 0), (padding, padding), (padding, padding)))
    Hp, Wp = h + 2 * padding, w + 2 * padding

    half = (ks - 1) // 2
    rng = jnp.arange(-half, half + 1)
    pnx, pny = jnp.meshgrid(rng, rng, indexing='ij')
    p_n = jnp.concatenate([pnx.reshape(-1), pny.reshape(-1)]).astype(jnp.float32)
    p0x, p0y = jnp.meshgrid(jnp.arange(1, h * stride + 1, stride),
                            jnp.arange(1, w * stride + 1, stride), indexing='ij')
    p_0 = jnp.concatenate([jnp.broadcast_to(p0x, (N, h, w)),
                           jnp.broadcast_to(p0y, (N, h, w))], 0).astype(jnp.float32)
    p = offset + p_0[None] + p_n[None, :, None, None]
    p = jnp.transpose(p, (0, 2, 3, 1))                               # (b,h,w,2N)

    q_lt = jnp.floor(p)
    q_rb = q_lt + 1
    qx_lt = jnp.clip(q_lt[..., :N], 0, Hp - 1); qy_lt = jnp.clip(q_lt[..., N:], 0, Wp - 1)
    qx_rb = jnp.clip(q_rb[..., :N], 0, Hp - 1); qy_rb = jnp.clip(q_rb[..., N:], 0, Wp - 1)
    pcx = jnp.clip(p[..., :N], 0, Hp - 1); pcy = jnp.clip(p[..., N:], 0, Wp - 1)

    g_lt = (1 + (qx_lt - pcx)) * (1 + (qy_lt - pcy))
    g_rb = (1 - (qx_rb - pcx)) * (1 - (qy_rb - pcy))
    g_lb = (1 + (qx_lt - pcx)) * (1 - (qy_rb - pcy))
    g_rt = (1 - (qx_rb - pcx)) * (1 + (qy_lt - pcy))

    x_flat = x_pad.reshape(b, c, Hp * Wp)

    def gather(qx, qy):
        idx = (qx * Wp + qy).astype(jnp.int32).reshape(b, 1, -1)
        idx = jnp.broadcast_to(idx, (b, c, idx.shape[-1]))
        return jnp.take_along_axis(x_flat, idx, axis=-1).reshape(b, c, h, w, N)

    x_q_lt = gather(qx_lt, qy_lt); x_q_rb = gather(qx_rb, qy_rb)
    x_q_lb = gather(qx_lt, qy_rb); x_q_rt = gather(qx_rb, qy_lt)

    x_offset = (g_lt[:, None] * x_q_lt + g_rb[:, None] * x_q_rb +
                g_lb[:, None] * x_q_lb + g_rt[:, None] * x_q_rt)

    w_r = conv_w.reshape(outc, c, N)
    out = jnp.einsum('ocn,bchwn->bohw', w_r, x_offset)
    return u[:, :, None, None] * out


if __name__ == "__main__":
    ks, padding, stride = 3, 1, 1
    b, inc, outc, h, w = 2, 8, 8, 16, 16
    hidden = int(inc * 0.25)
    N = ks * ks

    key = jax.random.PRNGKey(0)
    k = jax.random.split(key, 8)
    x = jax.random.normal(k[0], (b, inc, h, w), jnp.float32)

    # Parameters (deterministic). p_conv weight is zero per the module __init__;
    # its bias gives nonzero offsets so the bilinear sampling path is exercised.
    p_w = jnp.zeros((2 * N, inc, ks, ks), jnp.float32)
    p_b = jax.random.normal(k[1], (2 * N,), jnp.float32) * 0.7
    conv_w = jax.random.normal(k[2], (outc, inc, ks, ks), jnp.float32) * 0.2
    g1_w = jax.random.normal(k[3], (hidden, inc, 1, 1), jnp.float32) * 0.3
    g1_b = jax.random.normal(k[4], (hidden,), jnp.float32) * 0.1
    g2_w = jax.random.normal(k[5], (outc, hidden, 1, 1), jnp.float32) * 0.3
    g2_b = jax.random.normal(k[6], (outc,), jnp.float32) * 0.1
    params = (p_w, p_b, conv_w, g1_w, g1_b, g2_w, g2_b)

    out = adaptive_conv2d(x, params, ks=ks, padding=padding, stride=stride)
    out = jax.block_until_ready(out)

    ref = reference_forward(x, params, ks=ks, padding=padding, stride=stride)
    assert out.shape == (b, outc, h, w)
    assert jnp.allclose(out, ref, atol=1e-3, rtol=1e-3), "mismatch vs reference"
    print("KERNEL_OK")
</pallas_src>

<mosaic_0001>
module attributes {stable_mosaic.version = 11 : i64} {
  func.func @_adaptive_conv_kernel(%arg0: i32, %arg1: i32, %arg2: memref<1x72x256xf32, #tpu.memory_space<vmem>>, %arg3: memref<8x72xf32, #tpu.memory_space<vmem>>, %arg4: memref<1x8x1xf32, #tpu.memory_space<vmem>>, %arg5: memref<1x8x256xf32, #tpu.memory_space<vmem>>) attributes {dimension_semantics = [#tpu.dimension_semantics<parallel>, #tpu.dimension_semantics<parallel>], iteration_bounds = array<i64: 2, 1>, scalar_prefetch = 0 : i64, scratch_operands = 0 : i64, tpu.core_type = #tpu.core_type<tc>, window_params = [{transform_indices = @transform_0, window_bounds = array<i64: 1, 72, 256>}, {pipeline_mode = #tpu.pipeline_mode<synchronous>, transform_indices = @transform_1, window_bounds = array<i64: 8, 72>}, {transform_indices = @transform_2, window_bounds = array<i64: 1, 8, 1>}, {transform_indices = @transform_3, window_bounds = array<i64: 1, 8, 256>}]} {
    %c0 = arith.constant 0 : index
    %c0_0 = arith.constant 0 : index
    %0 = vector.load %arg3[%c0, %c0_0] : memref<8x72xf32, #tpu.memory_space<vmem>>, vector<8x72xf32>
    %c0_1 = arith.constant 0 : index
    %c0_2 = arith.constant 0 : index
    %c0_3 = arith.constant 0 : index
    %1 = vector.load %arg2[%c0_1, %c0_2, %c0_3] : memref<1x72x256xf32, #tpu.memory_space<vmem>>, vector<1x72x256xf32>
    %2 = vector.shape_cast %1 : vector<1x72x256xf32> to vector<72x256xf32>
    %cst = arith.constant dense<0.000000e+00> : vector<8x256xf32>
    %3 = tpu.matmul %0, %2, %cst {dimension_numbers = #tpu.dot_dimension_numbers<[1], [0], [0], [1], [0, 0, 1, 1], [], []>} : vector<8x72xf32>, vector<72x256xf32>, vector<8x256xf32> -> vector<8x256xf32>
    %c0_4 = arith.constant 0 : index
    %c0_5 = arith.constant 0 : index
    %c0_6 = arith.constant 0 : index
    %4 = vector.load %arg4[%c0_4, %c0_5, %c0_6] : memref<1x8x1xf32, #tpu.memory_space<vmem>>, vector<1x8x1xf32>
    %5 = vector.shape_cast %4 : vector<1x8x1xf32> to vector<8x1xf32>
    %6 = vector.broadcast %5 : vector<8x1xf32> to vector<8x256xf32>
    %7 = arith.mulf %3, %6 : vector<8x256xf32>
    %c0_7 = arith.constant 0 : index
    %c0_8 = arith.constant 0 : index
    %c0_9 = arith.constant 0 : index
    %8 = vector.load %arg5[%c0_7, %c0_8, %c0_9] : memref<1x8x256xf32, #tpu.memory_space<vmem>>, vector<1x8x256xf32>
    %9 = vector.shape_cast %8 : vector<1x8x256xf32> to vector<8x256xf32>
    %10 = vector.shape_cast %7 : vector<8x256xf32> to vector<1x8x256xf32>
    tpu.vector_store %arg5[%c0_7, %c0_8, %c0_9], %10 {strides = array<i32>} : memref<1x8x256xf32, #tpu.memory_space<vmem>>, vector<1x8x256xf32>,
    return
  }
  func.func @transform_0(%arg0: i32, %arg1: i32) -> (i32, i32, i32) {
    %c0_i32 = arith.constant 0 : i32
    %c0_i32_0 = arith.constant 0 : i32
    return %arg0, %c0_i32, %arg1 : i32, i32, i32
  }
  func.func @transform_1(%arg0: i32, %arg1: i32) -> (i32, i32) {
    %c0_i32 = arith.constant 0 : i32
    %c0_i32_0 = arith.constant 0 : i32
    %c0_i32_1 = arith.constant 0 : i32
    return %c0_i32, %c0_i32_0 : i32, i32
  }
  func.func @transform_2(%arg0: i32, %arg1: i32) -> (i32, i32, i32) {
    %c0_i32 = arith.constant 0 : i32
    %c0_i32_0 = arith.constant 0 : i32
    %c0_i32_1 = arith.constant 0 : i32
    return %arg0, %c0_i32, %c0_i32_0 : i32, i32, i32
  }
  func.func @transform_3(%arg0: i32, %arg1: i32) -> (i32, i32, i32) {
    %c0_i32 = arith.constant 0 : i32
    %c0_i32_0 = arith.constant 0 : i32
    return %arg0, %c0_i32, %arg1 : i32, i32, i32
  }
}

</mosaic_0001>

<bundles_post_ra>
// kernel: tpu_custom_call.1
= control target key start
LH: loop header
LB: loop body
LE: loop exit
PB: predicated region body
PF: predicated region fallthrough
CT: control target
= control target key end

     0   :  { %8 = vsyncpa [#allocation3], 0  ;;  %s825_s0 = inlined_call_operand.hbm [shape: f32[2,72,256], index: 0, kind: input, shape index: {}]   ;;  %s826_s1 = inlined_call_operand.vmem [shape: f32[8,72], index: 1, kind: input, shape index: {}]   ;;  %s827_s2 = inlined_call_operand.vmem [shape: f32[2,8,1], index: 2, kind: input, shape index: {}]   ;;  %s828_s3 = inlined_call_operand.hbm [shape: f32[2,8,256], index: 3, kind: output, shape index: {}]  }
   0x1   :  { %10 = vsyncpa [#allocation3 + $0x1], 0 }
   0x2   :  { %11 = vsyncpa [#allocation4], 0 }
   0x3   :  { %13 = vsyncpa [#allocation4 + $0x1], 0  ;;  %s664_s12 = smov 0   ;;  %s666_s13 = smov 0  }
   0x4   :  { %s668_s14 = smov 0   ;;  %s670_s15 = smov 0  }
   0x5   :  { %s672_s16 = smov 0   ;;  %s674_s17 = smov 0  }
   0x6 LB: > { %s443_s18 = sadd.s32 4294967295, %s636_s17   ;;  %s444_s19 = sadd.s32 4294967294, %s636_s17   ;;  %s636_s17 = sphi %s674_s17, %s19_s17   ;;  %s632_s16 = sphi %s672_s16, %s839_s16   ;;  %s628_s15 = sphi %s670_s15, %s838_s15   ;;  %s624_s14 = sphi %s668_s14, %s837_s14   ;;  %s620_s13 = sphi %s666_s13, %s836_s13   ;;  %s616_s12 = sphi %s664_s12, %s835_s12  }
   0x7   : > { %s31_s20 = sadd.s32 1, %s632_s16  ;;  %s40_s21 = sadd.s32 1, %s624_s14 }
   0x8   : > { %p33_p0 = scmp.ge.s32.totalorder %s31_s20, 2  ;;  %p47_p1 = scmp.ne.s32.totalorder %s624_s14, %s620_s13 }
   0x9   : > { %p48_p2 = scmp.eq.s32.totalorder %s636_s17, 0  ;;  %p53_p3 = scmp.ne.s32.totalorder %s620_s13, %s616_s12 }
   0xa   : > { %s841_s20 = smov (%p33_p0, %s31_s20), 0  ;;  %p54_p5 = scmp.eq.s32.totalorder %s443_s18, 0 }
   0xb   : > { %p705_p4 = por %p48_p2, %p47_p1  ;;  %s35_s23 = ssub.s32 %s632_s16, %s841_s20 }
   0xc   : > { %p126_p6 = scmp.eq.s32.totalorder %s443_s18, 1  ;;  %p38_p7 = scmp.eq.s32.totalorder %s35_s23, 0 }
   0xd   : > { %p711_p8 = por %p54_p5, %p53_p3  ;;  %p132_p10 = scmp.eq.s32.totalorder %s444_s19, 1 }
   0xe   : > { %p715_p9 = por %p126_p6, %p47_p1  ;;  %p473_p13 = scmp.lt.s32.totalorder %s636_s17, 2 }
   0xf   : > { %s720_s26 = scalar_select %p38_p7, %s624_s14, %s40_s21  }
  0x10   : > { %p722_p11 = por %p132_p10, %p53_p3  ;;  %s155_s28 = sand.u32 1, %s624_s14  }
  0x11   : > { %s458_s29 = smul.u32 144, %s155_s28  ;;  %p732_p0 = pnand %p473_p13, %p705_p4 }
  0x12   : > { %s459_s30 = smul.u32 2304, %s632_s16  ;;  %p448_p1 = scmp.ge.s32.totalorder %s636_s17, 1 }
  0x13   : > { %s159_s8 = scalar_lea.vmem [#allocation2], %s458_s29  ;;  %s156_s10 = scalar_lea.sflag [#allocation3], %s155_s28 }
  0x14   : > { %s167_s7 = scalar_lea.hbm %s825_s0, %s459_s30  ;;  %s168_s9 = sshll.u32 %s159_s8, 4  ;;  %s169_s9 = int_to_ptr.vmem [resolvable:$true] %s168_s9 }
  0x15   : > { %p530_p2 = pneg %p732_p0  ;;  %s541_s11 = scalar_lea.vmem %s169_s9, 2304 }
  0x16   : > { %p542_p3 = scmp.ne.s32.totalorder %s169_s9, %s541_s11  ;;  %s638_s18 = smov [#allocation2]  }
  0x17   : > { %s546_s19 = sshll.u32 %s638_s18, 4  ;;  %s547_s19 = int_to_ptr.vmem [resolvable:$false] %s546_s19 }
  0x18   : > { %p544_p5 = pnand %p542_p3, %p530_p2  ;;  %s548_s21 = scalar_lea.vmem %s547_s19, 4608 }
  0x19   : > { %p549_p4 = scmp.lt.s32.totalorder %s169_s9, %s547_s19  ;;  %p550_p7 = scmp.lt.s32.totalorder %s548_s21, %s541_s11 }
  0x1a   : > { %p545_p6 = pneg %p544_p5 }
  0x1b   : > { %p551_p10 = por %p550_p7, %p549_p4 }
  0x1d   : > { %p552_p13 = pnand %p551_p10, %p545_p6 }
  0x1f   : > { %555 = shalt.err (!%p552_p13)
}
  0x20   : > { %s639_s22 = smov 256   ;;  %s640_s23 = smov 16  }
  0x21   : > { %468 = dma.hbm_to_vmem [thread:$0]  (!%p732_p0), %s167_s7, 2304, %s169_s9, %s156_s10, %s639_s22, %s639_s22, %s640_s23  }
  0x22   : > { %p183_p12 = scmp.lt.s32.totalorder %s636_s17, 3 }
  0x24   : > { %p184_p2 = pnand %p448_p1, %p183_p12 }
  0x25   : > { %s748_s28 = sand.u32 (!%p184_p2), 1, %s620_s13  }
  0x26   : > { %187 = sbr.rel (%p184_p2) target bundleno = 274 (0x112), region = 32  ;;  %s190_s30 = scalar_lea.sflag (!%p184_p2), [#allocation3], %s748_s28 }
  0x27   : > { %s460_s29 = smul.u32 (!%p184_p2), 144, %s748_s28 }
  0x29   : > { %s752_s5 = scalar_lea.vmem (!%p184_p2), [#allocation2], %s460_s29 }
  0x2b   : > { %607 = dma.done.wait (%p711_p8), %s190_s30, 2304  }
  0x2c   : > { %609 = vsyncadd (%p711_p8), %s190_s30, 4294964992  ;;  %p221_p12 = scmp.lt.s32.totalorder %s628_s15, 1  ;;  %v641_v0 = vmov 0.0   ;;  %v642_v1 = vmov 0   ;;  %v244_v2 = vld [vmem:[%s752_s5 + $0x88] sm:$0xff]  ;;  %v243_v3 = vld [vmem:[%s752_s5 + $0x80] sm:$0xff] }
  0x2d   : > { %313 = vmatprep.mubr.f32.mxu0 %v641_v0  ;;  %527 = vset.pattern.permute.xlu0 %v642_v1  ;;  %v242_v4 = vld [vmem:[%s752_s5 + $0x78] sm:$0xff]  ;;  %v241_v5 = vld [vmem:[%s752_s5 + $0x70] sm:$0xff]  ;;  %v240_v6 = vld [vmem:[%s752_s5 + $0x68] sm:$0xff]  ;;  %vm245_vm0 = vcmask 588800   ;;  %s449_s11 = sshll.u32 %s748_s28, 4  ;;  %s457_s18 = sshll.u32 %s628_s15, 8 }
  0x2e   : > { %s222_s4 = scalar_select %p221_p12, %s628_s15, 1  ;;  %263 = vmatprep.subr.mxu0 %v244_v2  ;;  %v239_v7 = vld [vmem:[%s752_s5 + $0x60] sm:$0xff]  ;;  %v238_v8 = vld [vmem:[%s752_s5 + $0x58] sm:$0xff]  ;;  %v237_v9 = vld [vmem:[%s752_s5 + $0x50] sm:$0xff] }
  0x2f   : > { %264 = vmatpush1.msra.mxu0 %v243_v3  ;;  %v236_v10 = vld [vmem:[%s752_s5 + $0x48] sm:$0xff]  ;;  %v235_v12 = vld [vmem:[%s752_s5 + $0x40] sm:$0xff]  ;;  %v234_v13 = vld [vmem:[%s752_s5 + $0x38] sm:$0xff]  ;;  %s219_s19 = scalar_lea.vmem [#allocation5], %s449_s11  ;;  %s345_s29 = scalar_lea.hbm %s828_s3, %s457_s18 }
  0x30   : > { %s450_s24 = sshll.u32 %s222_s4, 3  ;;  %265 = vmatprep.subr.mxu0 %v242_v4  ;;  %v233_v14 = vld [vmem:[%s752_s5 + $0x30] sm:$0xff]  ;;  %v232_v15 = vld [vmem:[%s752_s5 + $0x28] sm:$0xff]  ;;  %v231_v16 = vld [vmem:[%s752_s5 + $0x20] sm:$0xff]  ;;  %s347_s21 = sshll.u32 %s219_s19, 4  ;;  %s348_s21 = int_to_ptr.vmem [resolvable:$true] %s347_s21 }
  0x31   : > { %s224_s8 = scalar_lea.vmem %s827_s2, %s450_s24  ;;  %266 = vmatpush1.msra.mxu0 %v241_v5  ;;  %v230_v17 = vld [vmem:[%s752_s5 + $0x18] sm:$0xff]  ;;  %v229_v18 = vld [vmem:[%s752_s5 + $0x10] sm:$0xff]  ;;  %v228_v19 = vld [vmem:[%s752_s5 + $0x8] sm:$0xff]  ;;  %s331_s30 = scalar_lea.sflag [#allocation4], %s748_s28 }
  0x32   : > { %267 = vmatprep.subr.mxu0 %v240_v6  ;;  %v320_v11 = vld [vmem:[%s224_s8] sm:$0xff]  ;;  %s643_s4 = smov [#allocation5]  }
  0x33   : > { %268 = vmatpush1.msra.mxu0 %v239_v7  ;;  %323 = vperm.xlu0 %527, %v320_v11   ;;  %v227_v20 = vld [vmem:[%s752_s5] sm:$0xff]  ;;  %s556_s5 = scalar_lea.vmem %s348_s21, 256  ;;  %s560_s15 = sshll.u32 %s643_s4, 4  ;;  %s561_s15 = int_to_ptr.vmem [resolvable:$false] %s560_s15 }
  0x34   : > { %269 = vmatprep.subr.mxu0 %v238_v8  ;;  %v226_v21 = vld [vmem:[%s826_s1] sm:$0xff]  ;;  %p557_p8 = scmp.ne.s32.totalorder %s348_s21, %s556_s5  ;;  %s562_s24 = scalar_lea.vmem %s561_s15, 512 }
  0x35   : > { %270 = vmatpush1.msra.mxu0 %v237_v9  ;;  %p563_p3 = scmp.lt.s32.totalorder %s348_s21, %s561_s15  ;;  %p564_p5 = scmp.lt.s32.totalorder %s562_s24, %s556_s5 }
  0x36   : > { %271 = vmatprep.subr.mxu0 %v236_v10  ;;  %p558_p0 = pnand %p557_p8, %p715_p9 }
  0x37   : > { %272 = vmatpush1.msra.mxu0 %v235_v12  ;;  %p565_p6 = por %p564_p5, %p563_p3 }
  0x38   : > { %273 = vmatprep.subr.mxu0 %v234_v13  ;;  %p559_p1 = pneg %p558_p0 }
  0x39   : > { %274 = vmatpush1.msra.mxu0 %v233_v14 }
  0x3a   : > { %275 = vmatprep.subr.mxu0 %v232_v15  ;;  %p566_p4 = pnand %p565_p6, %p559_p1 }
  0x3b   : > { %276 = vmatpush1.msra.mxu0 %v231_v16 }
  0x3c   : > { %277 = vmatprep.subr.mxu0 %v230_v17 }
  0x3d   : > { %278 = vmatpush1.msra.mxu0 %v229_v18 }
  0x3e   : > { %279 = vmatprep.subr.mxu0 %v228_v19 }
  0x3f   : > { %280 = vmatpush1.msra.mxu0 %v227_v20 }
  0x40   : > { %451 = vmatmul.mubr.msk.f32.vlgmr.msra.gmra.mxu0 %vm245_vm0, %v226_v21 }
  0xae   : > { %v324_v22 = vpop.permute.xlu0 %323 }
 0x100   : > { %v315_v23 = vpop.f32.mrf.mxu0 }
 0x101   : > { %v326_v24 = vmul.f32 %v324_v22, %v315_v23 }
 0x102   : > { %v317_v25 = vpop.f32.mrf.mxu0 }
 0x103   : > { %328 = vst [vmem:[%s219_s19] sm:$0xff] %v326_v24  ;;  %v327_v26 = vmul.f32 %v324_v22, %v317_v25 }
 0x105   : > { %329 = vst [vmem:[%s219_s19 + $0x8] sm:$0xff] %v327_v26 }
 0x106   : > { %569 = shalt.err (!%p566_p4)
}
 0x107   : > { %s570_s6 = scalar_lea.hbm %s345_s29, 256  ;;  %s574_s8 = scalar_lea.hbm %s828_s3, 512 }
 0x108   : > { %p571_p7 = scmp.ne.s32.totalorder %s345_s29, %s570_s6  ;;  %p575_p2 = scmp.lt.s32.totalorder %s345_s29, %s828_s3 }
 0x109   : > { %p576_p12 = scmp.lt.s32.totalorder %s574_s8, %s570_s6 }
 0x10a   : > { %p572_p10 = pnand %p571_p7, %p715_p9 }
 0x10b   : > { %p577_p8 = por %p576_p12, %p575_p2 }
 0x10c   : > { %p573_p13 = pneg %p572_p10 }
 0x10e   : > { %p578_p0 = pnand %p577_p8, %p573_p13 }
 0x110   : > { %581 = shalt.err (!%p578_p0)
}
 0x111   : > { %463 = dma.vmem_to_hbm [thread:$0]  (%p715_p9), %s348_s21, 256, %s345_s29, %s331_s30  }
 0x112 PF: > { %s359_s11 = sand.u32 1, %s616_s12   ;;  %p834_p1 = scmp.ge.s32.totalorder %s636_s17, 2 }
 0x113   : > { %s360_s18 = scalar_lea.sflag [#allocation4], %s359_s11 }
 0x114   : > { %p470_p3 = pnand %p834_p1, %p722_p11 }
 0x116   : > { %p471_p5 = pneg %p470_p3 }
 0x118   : > { %611 = dma.done.wait (%p471_p5), %s360_s18, 256  }
 0x119   : > { %613 = vsyncadd (%p471_p5), %s360_s18, 4294967040  ;;  %s19_s17 = sadd.s32 1, %s636_s17   ;;  %s835_s12 = smov %s620_s13 }
 0x11a   : > { %p16_p6 = scmp.ge.s32.totalorder %s19_s17, 4   ;;  %s836_s13 = smov %s624_s14 }
 0x11b   : > { %s837_s14 = smov %s720_s26  ;;  %s838_s15 = smov %s632_s16 }
 0x11c   : > { %s839_s16 = smov %s841_s20  ;;  %18 = sbr.rel (!%p16_p6) target bundleno = 6 (0x6), region = 80 }
 0x121   :  { %365 = vsyncpa [#allocation3], 1 }
 0x122   :  { %367 = vsyncpa [#allocation3 + $0x1], 1 }
 0x123   :  { %368 = vsyncpa [#allocation4], 1 }
 0x124   :  { %370 = vsyncpa [#allocation4 + $0x1], 1 }

</bundles_post_ra>
